<compile_context>
chip_gen: v6e
topology: v6e:2x2x1
jax: 0.10.0
libtpu: 0.0.40
codegen_flags: <defaults>
</compile_context>

<pallas_src>
import numpy as np
import jax
import jax.numpy as jnp
from jax.experimental import pallas as pl
from jax.experimental.pallas import tpu as pltpu


BN_EPS = 1e-5
PAD_IN = 128        # statistic feature dim padded 26 -> 128 (lane-dense, clean MXU tile)
OUT_PAD = 128       # fused classifier padded num_classes -> 128 (unmasked stores)
MAX_BATCH_ROWS = 8192  # whole batch must fit VMEM (training-mode BN couples the batch)


# ---------------------------------------------------------------------------
# Kernel
# ---------------------------------------------------------------------------
def dnn_kernel(x_ref,
               w1_ref, b1_ref, g1_ref, be1_ref,
               w2_ref, b2_ref, g2_ref, be2_ref,
               w3_ref, b3_ref, g3_ref, be3_ref,
               w45_ref, b45_ref,
               out_ref):
    def linear(h, w_ref, b_ref):
        # Compute dtype follows the stored weight dtype (f32 or bf16);
        # accumulation is always f32 on the MXU, bias add in f32.
        w = w_ref[...]
        return jnp.dot(h.astype(w.dtype), w,
                       preferred_element_type=jnp.float32) + b_ref[...]

    def batchnorm(h, g_ref, be_ref):
        # Training-mode BatchNorm1d, single-pass statistics:
        #   var = E[h^2] - mu^2  (one XLU reduction pair, no second VPU pass)
        mu = jnp.mean(h, axis=0, keepdims=True)
        msq = jnp.mean(h * h, axis=0, keepdims=True)
        var = jnp.maximum(msq - mu * mu, 0.0)
        scale = g_ref[...] * jax.lax.rsqrt(var + BN_EPS)   # rsqrt -> EUP slot
        shift = be_ref[...] - mu * scale
        return h * scale + shift                            # single fused VPU pass

    # Standardisation already folded into (w1, b1); input is lane-dense (B, 128).
    h = batchnorm(linear(x_ref[...], w1_ref, b1_ref), g1_ref, be1_ref)   # (B, 128)
    h = batchnorm(linear(h, w2_ref, b2_ref), g2_ref, be2_ref)            # (B, 512)
    h = batchnorm(linear(h, w3_ref, b3_ref), g3_ref, be3_ref)            # (B, 128)

    # Fused classifier (128 -> OUT_PAD); padded columns are exact zeros.
    out_ref[...] = linear(h, w45_ref, b45_ref).astype(out_ref.dtype)     # (B, 128)


# ---------------------------------------------------------------------------
# Host-side parameter folding (done once, outside the forward path)
# ---------------------------------------------------------------------------
def fold_params(params, num_classes, *, use_bf16=False):
    """Fold standardisation into layer 1, fuse classifier, pad to lane-dense shapes."""
    inv_std = 1.0 / params["std"]                                    # (1, 26)
    w1 = params["w1"] * inv_std.reshape(-1, 1)                       # (26, 128)
    b1 = params["b1"] - (params["mean"] * inv_std) @ params["w1"]    # (1, 128)
    w1 = jnp.pad(w1, ((0, PAD_IN - w1.shape[0]), (0, 0)))            # (128, 128)

    w45 = params["w4"] @ params["w5"]                                # (128, C)
    b45 = params["b4"] @ params["w5"] + params["b5"]                 # (1, C)
    w45 = jnp.pad(w45, ((0, 0), (0, OUT_PAD - num_classes)))         # (128, 128)
    b45 = jnp.pad(b45, ((0, 0), (0, OUT_PAD - num_classes)))         # (1, 128)

    wdt = jnp.bfloat16 if use_bf16 else jnp.float32
    return {
        "w1": w1.astype(wdt), "b1": b1, "g1": params["g1"], "be1": params["be1"],
        "w2": params["w2"].astype(wdt), "b2": params["b2"],
        "g2": params["g2"], "be2": params["be2"],
        "w3": params["w3"].astype(wdt), "b3": params["b3"],
        "g3": params["g3"], "be3": params["be3"],
        "w45": w45.astype(wdt), "b45": b45,
    }


# ---------------------------------------------------------------------------
# Forward wrapper
# ---------------------------------------------------------------------------
def deep_nn_forward(pcap, statistic, folded, *, num_classes):
    """Pallas forward. `pcap` is accepted for API parity but unused (as in PyTorch)."""
    del pcap  # unused by the PyTorch forward as well
    B, F = statistic.shape
    assert B <= MAX_BATCH_ROWS, "batch too large for single-invocation training-mode BN"
    # TODO(synk): implement tiled multi-pass BN statistics for B > MAX_BATCH_ROWS.

    # Lane-dense input: pad feature dim 26 -> 128 (zero rows of w1 make it exact).
    x = jnp.pad(statistic.astype(jnp.float32), ((0, 0), (0, PAD_IN - F)))

    args = (
        x,
        folded["w1"], folded["b1"], folded["g1"], folded["be1"],
        folded["w2"], folded["b2"], folded["g2"], folded["be2"],
        folded["w3"], folded["b3"], folded["g3"], folded["be3"],
        folded["w45"], folded["b45"],
    )
    vmem_spec = pl.BlockSpec(memory_space=pltpu.MemorySpace.VMEM)

    out_pad = pl.pallas_call(
        dnn_kernel,
        out_shape=jax.ShapeDtypeStruct((B, OUT_PAD), jnp.float32),
        in_specs=[vmem_spec] * len(args),
        out_specs=vmem_spec,
        compiler_params=pltpu.CompilerParams(vmem_limit_bytes=48 * 1024 * 1024),
    )(*args)

    return out_pad[:, :num_classes]


# ---------------------------------------------------------------------------
# Synthetic parameters + pure-JAX reference (original, un-folded semantics)
# ---------------------------------------------------------------------------
def make_params(key, num_classes=12):
    """Deterministic synthetic parameters matching DeepNN.__init__ shapes."""
    dims = [(26, 128), (128, 512), (512, 128), (128, 24), (24, num_classes)]
    keys = jax.random.split(key, 2 * len(dims) + 2)
    params = {}
    for i, (fin, fout) in enumerate(dims, start=1):
        bound = 1.0 / np.sqrt(fin)
        params[f"w{i}"] = jax.random.uniform(
            keys[2 * (i - 1)], (fin, fout), jnp.float32, -bound, bound)
        params[f"b{i}"] = jax.random.uniform(
            keys[2 * (i - 1) + 1], (1, fout), jnp.float32, -bound, bound)
    for i, width in zip((1, 2, 3), (128, 512, 128)):
        params[f"g{i}"] = jnp.ones((1, width), jnp.float32) * (1.0 + 0.01 * i)
        params[f"be{i}"] = jnp.full((1, width), 0.05 * i, jnp.float32)
    params["mean"] = jax.random.normal(keys[-2], (1, 26), jnp.float32)
    params["std"] = jnp.abs(jax.random.normal(keys[-1], (1, 26), jnp.float32)) + 0.5
    return params


def deep_nn_reference(statistic, params):
    """Pure-JAX reference of the original (un-folded, two-pass BN) forward pass."""
    x = (statistic - params["mean"]) / params["std"]

    def linear(h, i):
        return h @ params[f"w{i}"] + params[f"b{i}"]

    def bn(h, i):
        mu = jnp.mean(h, axis=0, keepdims=True)
        var = jnp.mean((h - mu) ** 2, axis=0, keepdims=True)
        return (h - mu) / jnp.sqrt(var + BN_EPS) * params[f"g{i}"] + params[f"be{i}"]

    h = bn(linear(x, 1), 1)
    h = bn(linear(h, 2), 2)
    h = bn(linear(h, 3), 3)
    return linear(linear(h, 4), 5)


# ---------------------------------------------------------------------------
# Main
# ---------------------------------------------------------------------------
if __name__ == "__main__":
    key = jax.random.PRNGKey(0)
    k_stat, k_pcap, k_params = jax.random.split(key, 3)

    B = 8
    num_classes = 12
    statistic = jax.random.normal(k_stat, (B, 26), jnp.float32)
    # pcap exists in the signature but is never used by forward; keep a small dummy.
    pcap = jax.random.normal(k_pcap, (B, 1, 16, 16), jnp.float32)

    params = make_params(k_params, num_classes=num_classes)
    ref = deep_nn_reference(statistic, params)

    fwd = jax.jit(deep_nn_forward, static_argnames="num_classes")

    # --- f32 weights: exact-semantics check against the un-folded reference ---
    folded_f32 = fold_params(params, num_classes, use_bf16=False)
    out_f32 = jax.block_until_ready(fwd(pcap, statistic, folded_f32,
                                        num_classes=num_classes))
    assert out_f32.shape == (B, num_classes)
    assert jnp.allclose(out_f32, ref, atol=1e-3, rtol=1e-3), \
        "Pallas f32 output mismatch vs reference"

    # --- bf16 matmul path (v6e/v7x fast path): loose-tolerance sanity check ---
    folded_bf16 = fold_params(params, num_classes, use_bf16=True)
    out_bf16 = jax.block_until_ready(fwd(pcap, statistic, folded_bf16,
                                         num_classes=num_classes))
    assert out_bf16.shape == (B, num_classes)
    assert jnp.all(jnp.isfinite(out_bf16))
    assert jnp.allclose(out_bf16, ref, atol=5e-2, rtol=5e-2), \
        "Pallas bf16 output mismatch vs reference"

    print("KERNEL_OK")
</pallas_src>

<mosaic_0001>
module attributes {stable_mosaic.version = 11 : i64} {
  func.func @dnn_kernel(%arg0: memref<8x128xf32, #tpu.memory_space<vmem>>, %arg1: memref<128x128xf32, #tpu.memory_space<vmem>>, %arg2: memref<1x128xf32, #tpu.memory_space<vmem>>, %arg3: memref<1x128xf32, #tpu.memory_space<vmem>>, %arg4: memref<1x128xf32, #tpu.memory_space<vmem>>, %arg5: memref<128x512xf32, #tpu.memory_space<vmem>>, %arg6: memref<1x512xf32, #tpu.memory_space<vmem>>, %arg7: memref<1x512xf32, #tpu.memory_space<vmem>>, %arg8: memref<1x512xf32, #tpu.memory_space<vmem>>, %arg9: memref<512x128xf32, #tpu.memory_space<vmem>>, %arg10: memref<1x128xf32, #tpu.memory_space<vmem>>, %arg11: memref<1x128xf32, #tpu.memory_space<vmem>>, %arg12: memref<1x128xf32, #tpu.memory_space<vmem>>, %arg13: memref<128x128xf32, #tpu.memory_space<vmem>>, %arg14: memref<1x128xf32, #tpu.memory_space<vmem>>, %arg15: memref<8x128xf32, #tpu.memory_space<vmem>>) attributes {dimension_semantics = [], scalar_prefetch = 0 : i64, scratch_operands = 0 : i64, tpu.core_type = #tpu.core_type<tc>} {
    %c0 = arith.constant 0 : index
    %c0_0 = arith.constant 0 : index
    %0 = vector.load %arg0[%c0, %c0_0] : memref<8x128xf32, #tpu.memory_space<vmem>>, vector<8x128xf32>
    %c0_1 = arith.constant 0 : index
    %c0_2 = arith.constant 0 : index
    %1 = vector.load %arg1[%c0_1, %c0_2] : memref<128x128xf32, #tpu.memory_space<vmem>>, vector<128x128xf32>
    %cst = arith.constant dense<0.000000e+00> : vector<8x128xf32>
    %2 = tpu.matmul %0, %1, %cst {dimension_numbers = #tpu.dot_dimension_numbers<[1], [0], [0], [1], [0, 0, 1, 1], [], []>} : vector<8x128xf32>, vector<128x128xf32>, vector<8x128xf32> -> vector<8x128xf32>
    %c0_3 = arith.constant 0 : index
    %c0_4 = arith.constant 0 : index
    %3 = vector.load %arg2[%c0_3, %c0_4] : memref<1x128xf32, #tpu.memory_space<vmem>>, vector<1x128xf32>
    %4 = vector.broadcast %3 : vector<1x128xf32> to vector<8x128xf32>
    %5 = arith.addf %2, %4 : vector<8x128xf32>
    %cst_5 = arith.constant dense<0.000000e+00> : vector<128xf32>
    %6 = vector.multi_reduction <add>, %5, %cst_5 [0] : vector<8x128xf32> to vector<128xf32>
    %7 = vector.shape_cast %6 : vector<128xf32> to vector<1x128xf32>
    %cst_6 = arith.constant 8.000000e+00 : f32
    %8 = vector.broadcast %cst_6 : f32 to vector<1x128xf32>
    %9 = arith.divf %7, %8 : vector<1x128xf32>
    %10 = arith.mulf %5, %5 : vector<8x128xf32>
    %cst_7 = arith.constant dense<0.000000e+00> : vector<128xf32>
    %11 = vector.multi_reduction <add>, %10, %cst_7 [0] : vector<8x128xf32> to vector<128xf32>
    %12 = vector.shape_cast %11 : vector<128xf32> to vector<1x128xf32>
    %cst_8 = arith.constant 8.000000e+00 : f32
    %13 = vector.broadcast %cst_8 : f32 to vector<1x128xf32>
    %14 = arith.divf %12, %13 : vector<1x128xf32>
    %15 = arith.mulf %9, %9 : vector<1x128xf32>
    %16 = arith.subf %14, %15 : vector<1x128xf32>
    %cst_9 = arith.constant 0.000000e+00 : f32
    %17 = vector.broadcast %cst_9 : f32 to vector<1x128xf32>
    %18 = arith.maximumf %16, %17 : vector<1x128xf32>
    %c0_10 = arith.constant 0 : index
    %c0_11 = arith.constant 0 : index
    %19 = vector.load %arg3[%c0_10, %c0_11] : memref<1x128xf32, #tpu.memory_space<vmem>>, vector<1x128xf32>
    %cst_12 = arith.constant 9.99999974E-6 : f32
    %20 = vector.broadcast %cst_12 : f32 to vector<1x128xf32>
    %21 = arith.addf %18, %20 : vector<1x128xf32>
    %22 = math.rsqrt %21 : vector<1x128xf32>
    %23 = arith.mulf %19, %22 : vector<1x128xf32>
    %c0_13 = arith.constant 0 : index
    %c0_14 = arith.constant 0 : index
    %24 = vector.load %arg4[%c0_13, %c0_14] : memref<1x128xf32, #tpu.memory_space<vmem>>, vector<1x128xf32>
    %25 = arith.mulf %9, %23 : vector<1x128xf32>
    %26 = arith.subf %24, %25 : vector<1x128xf32>
    %27 = vector.broadcast %23 : vector<1x128xf32> to vector<8x128xf32>
    %28 = arith.mulf %5, %27 : vector<8x128xf32>
    %29 = vector.broadcast %26 : vector<1x128xf32> to vector<8x128xf32>
    %30 = arith.addf %28, %29 : vector<8x128xf32>
    %c0_15 = arith.constant 0 : index
    %c0_16 = arith.constant 0 : index
    %31 = vector.load %arg5[%c0_15, %c0_16] : memref<128x512xf32, #tpu.memory_space<vmem>>, vector<128x512xf32>
    %cst_17 = arith.constant dense<0.000000e+00> : vector<8x512xf32>
    %32 = tpu.matmul %30, %31, %cst_17 {dimension_numbers = #tpu.dot_dimension_numbers<[1], [0], [0], [1], [0, 0, 1, 1], [], []>} : vector<8x128xf32>, vector<128x512xf32>, vector<8x512xf32> -> vector<8x512xf32>
    %c0_18 = arith.constant 0 : index
    %c0_19 = arith.constant 0 : index
    %33 = vector.load %arg6[%c0_18, %c0_19] : memref<1x512xf32, #tpu.memory_space<vmem>>, vector<1x512xf32>
    %34 = vector.broadcast %33 : vector<1x512xf32> to vector<8x512xf32>
    %35 = arith.addf %32, %34 : vector<8x512xf32>
    %cst_20 = arith.constant dense<0.000000e+00> : vector<512xf32>
    %36 = vector.multi_reduction <add>, %35, %cst_20 [0] : vector<8x512xf32> to vector<512xf32>
    %37 = vector.shape_cast %36 : vector<512xf32> to vector<1x512xf32>
    %cst_21 = arith.constant 8.000000e+00 : f32
    %38 = vector.broadcast %cst_21 : f32 to vector<1x512xf32>
    %39 = arith.divf %37, %38 : vector<1x512xf32>
    %40 = arith.mulf %35, %35 : vector<8x512xf32>
    %cst_22 = arith.constant dense<0.000000e+00> : vector<512xf32>
    %41 = vector.multi_reduction <add>, %40, %cst_22 [0] : vector<8x512xf32> to vector<512xf32>
    %42 = vector.shape_cast %41 : vector<512xf32> to vector<1x512xf32>
    %cst_23 = arith.constant 8.000000e+00 : f32
    %43 = vector.broadcast %cst_23 : f32 to vector<1x512xf32>
    %44 = arith.divf %42, %43 : vector<1x512xf32>
    %45 = arith.mulf %39, %39 : vector<1x512xf32>
    %46 = arith.subf %44, %45 : vector<1x512xf32>
    %cst_24 = arith.constant 0.000000e+00 : f32
    %47 = vector.broadcast %cst_24 : f32 to vector<1x512xf32>
    %48 = arith.maximumf %46, %47 : vector<1x512xf32>
    %c0_25 = arith.constant 0 : index
    %c0_26 = arith.constant 0 : index
    %49 = vector.load %arg7[%c0_25, %c0_26] : memref<1x512xf32, #tpu.memory_space<vmem>>, vector<1x512xf32>
    %cst_27 = arith.constant 9.99999974E-6 : f32
    %50 = vector.broadcast %cst_27 : f32 to vector<1x512xf32>
    %51 = arith.addf %48, %50 : vector<1x512xf32>
    %52 = math.rsqrt %51 : vector<1x512xf32>
    %53 = arith.mulf %49, %52 : vector<1x512xf32>
    %c0_28 = arith.constant 0 : index
    %c0_29 = arith.constant 0 : index
    %54 = vector.load %arg8[%c0_28, %c0_29] : memref<1x512xf32, #tpu.memory_space<vmem>>, vector<1x512xf32>
    %55 = arith.mulf %39, %53 : vector<1x512xf32>
    %56 = arith.subf %54, %55 : vector<1x512xf32>
    %57 = vector.broadcast %53 : vector<1x512xf32> to vector<8x512xf32>
    %58 = arith.mulf %35, %57 : vector<8x512xf32>
    %59 = vector.broadcast %56 : vector<1x512xf32> to vector<8x512xf32>
    %60 = arith.addf %58, %59 : vector<8x512xf32>
    %c0_30 = arith.constant 0 : index
    %c0_31 = arith.constant 0 : index
    %61 = vector.load %arg9[%c0_30, %c0_31] : memref<512x128xf32, #tpu.memory_space<vmem>>, vector<512x128xf32>
    %cst_32 = arith.constant dense<0.000000e+00> : vector<8x128xf32>
    %62 = tpu.matmul %60, %61, %cst_32 {dimension_numbers = #tpu.dot_dimension_numbers<[1], [0], [0], [1], [0, 0, 1, 1], [], []>} : vector<8x512xf32>, vector<512x128xf32>, vector<8x128xf32> -> vector<8x128xf32>
    %c0_33 = arith.constant 0 : index
    %c0_34 = arith.constant 0 : index
    %63 = vector.load %arg10[%c0_33, %c0_34] : memref<1x128xf32, #tpu.memory_space<vmem>>, vector<1x128xf32>
    %64 = vector.broadcast %63 : vector<1x128xf32> to vector<8x128xf32>
    %65 = arith.addf %62, %64 : vector<8x128xf32>
    %cst_35 = arith.constant dense<0.000000e+00> : vector<128xf32>
    %66 = vector.multi_reduction <add>, %65, %cst_35 [0] : vector<8x128xf32> to vector<128xf32>
    %67 = vector.shape_cast %66 : vector<128xf32> to vector<1x128xf32>
    %cst_36 = arith.constant 8.000000e+00 : f32
    %68 = vector.broadcast %cst_36 : f32 to vector<1x128xf32>
    %69 = arith.divf %67, %68 : vector<1x128xf32>
    %70 = arith.mulf %65, %65 : vector<8x128xf32>
    %cst_37 = arith.constant dense<0.000000e+00> : vector<128xf32>
    %71 = vector.multi_reduction <add>, %70, %cst_37 [0] : vector<8x128xf32> to vector<128xf32>
    %72 = vector.shape_cast %71 : vector<128xf32> to vector<1x128xf32>
    %cst_38 = arith.constant 8.000000e+00 : f32
    %73 = vector.broadcast %cst_38 : f32 to vector<1x128xf32>
    %74 = arith.divf %72, %73 : vector<1x128xf32>
    %75 = arith.mulf %69, %69 : vector<1x128xf32>
    %76 = arith.subf %74, %75 : vector<1x128xf32>
    %cst_39 = arith.constant 0.000000e+00 : f32
    %77 = vector.broadcast %cst_39 : f32 to vector<1x128xf32>
    %78 = arith.maximumf %76, %77 : vector<1x128xf32>
    %c0_40 = arith.constant 0 : index
    %c0_41 = arith.constant 0 : index
    %79 = vector.load %arg11[%c0_40, %c0_41] : memref<1x128xf32, #tpu.memory_space<vmem>>, vector<1x128xf32>
    %cst_42 = arith.constant 9.99999974E-6 : f32
    %80 = vector.broadcast %cst_42 : f32 to vector<1x128xf32>
    %81 = arith.addf %78, %80 : vector<1x128xf32>
    %82 = math.rsqrt %81 : vector<1x128xf32>
    %83 = arith.mulf %79, %82 : vector<1x128xf32>
    %c0_43 = arith.constant 0 : index
    %c0_44 = arith.constant 0 : index
    %84 = vector.load %arg12[%c0_43, %c0_44] : memref<1x128xf32, #tpu.memory_space<vmem>>, vector<1x128xf32>
    %85 = arith.mulf %69, %83 : vector<1x128xf32>
    %86 = arith.subf %84, %85 : vector<1x128xf32>
    %87 = vector.broadcast %83 : vector<1x128xf32> to vector<8x128xf32>
    %88 = arith.mulf %65, %87 : vector<8x128xf32>
    %89 = vector.broadcast %86 : vector<1x128xf32> to vector<8x128xf32>
    %90 = arith.addf %88, %89 : vector<8x128xf32>
    %c0_45 = arith.constant 0 : index
    %c0_46 = arith.constant 0 : index
    %91 = vector.load %arg13[%c0_45, %c0_46] : memref<128x128xf32, #tpu.memory_space<vmem>>, vector<128x128xf32>
    %cst_47 = arith.constant dense<0.000000e+00> : vector<8x128xf32>
    %92 = tpu.matmul %90, %91, %cst_47 {dimension_numbers = #tpu.dot_dimension_numbers<[1], [0], [0], [1], [0, 0, 1, 1], [], []>} : vector<8x128xf32>, vector<128x128xf32>, vector<8x128xf32> -> vector<8x128xf32>
    %c0_48 = arith.constant 0 : index
    %c0_49 = arith.constant 0 : index
    %93 = vector.load %arg14[%c0_48, %c0_49] : memref<1x128xf32, #tpu.memory_space<vmem>>, vector<1x128xf32>
    %94 = vector.broadcast %93 : vector<1x128xf32> to vector<8x128xf32>
    %95 = arith.addf %92, %94 : vector<8x128xf32>
    %c0_50 = arith.constant 0 : index
    %c0_51 = arith.constant 0 : index
    %96 = vector.load %arg15[%c0_50, %c0_51] : memref<8x128xf32, #tpu.memory_space<vmem>>, vector<8x128xf32>
    tpu.vector_store %arg15[%c0_50, %c0_51], %95 {strides = array<i32>} : memref<8x128xf32, #tpu.memory_space<vmem>>, vector<8x128xf32>,
    return
  }
}

</mosaic_0001>

<bundles_post_ra>
// kernel: deep_nn_forward.1
= control target key start
LH: loop header
LB: loop body
LE: loop exit
PB: predicated region body
PF: predicated region fallthrough
CT: control target
= control target key end

     0   :  { %20 = vsyncpa [#allocation3], 0  ;;  %s1571_s0 = inlined_call_operand.vmem [shape: f32[8,128], index: 0, kind: input, shape index: {}]   ;;  %s1572_s1 = inlined_call_operand.hbm [shape: f32[128,128], index: 1, kind: input, shape index: {}]   ;;  %s1573_s2 = inlined_call_operand.vmem [shape: f32[1,128], index: 2, kind: input, shape index: {}]   ;;  %s1574_s3 = inlined_call_operand.vmem [shape: f32[1,128], index: 3, kind: input, shape index: {}]   ;;  %s1575_s4 = inlined_call_operand.vmem [shape: f32[1,128], index: 4, kind: input, shape index: {}]   ;;  %s1576_s5 = inlined_call_operand.hbm [shape: f32[128,512], index: 5, kind: input, shape index: {}]   ;;  %s1577_s6 = inlined_call_operand.vmem [shape: f32[1,512], index: 6, kind: input, shape index: {}]   ;;  %s1578_s7 = inlined_call_operand.vmem [shape: f32[1,512], index: 7, kind: input, shape index: {}]   ;;  %s1579_s8 = inlined_call_operand.vmem [shape: f32[1,512], index: 8, kind: input, shape index: {}]   ;;  %s1580_s9 = inlined_call_operand.hbm [shape: f32[512,128], index: 9, kind: input, shape index: {}]   ;;  %s1581_s10 = inlined_call_operand.vmem [shape: f32[1,128], index: 10, kind: input, shape index: {}]   ;;  %s1582_s11 = inlined_call_operand.vmem [shape: f32[1,128], index: 11, kind: input, shape index: {}]   ;;  %s1583_s12 = inlined_call_operand.vmem [shape: f32[1,128], index: 12, kind: input, shape index: {}]   ;;  %s1584_s13 = inlined_call_operand.hbm [shape: f32[128,128], index: 13, kind: input, shape index: {}]   ;;  %s1585_s14 = inlined_call_operand.vmem [shape: f32[1,128], index: 14, kind: input, shape index: {}]   ;;  %s1586_s15 = inlined_call_operand.hbm [shape: f32[8,128], index: 15, kind: output, shape index: {}]  }
   0x1   :  { %21 = vsyncpa [#allocation6], 0 }
   0x2   :  { %22 = vsyncpa [#allocation9], 0 }
   0x3   :  { %23 = vsyncpa [#allocation4], 0  ;;  %s1334_s18 = smov [#allocation5]  }
   0x4   :  { %s49_s19 = sshll.u32 %s1334_s18, 4  ;;  %s50_s19 = int_to_ptr.vmem [resolvable:$true] %s49_s19 }
   0x5   :  { %s1234_s20 = scalar_lea.vmem %s50_s19, 8192  ;;  %p1239_p1 = scmp.lt.s32.totalorder %s50_s19, %s50_s19 }
   0x6   :  { %p1235_p0 = scmp.ne.s32.totalorder %s50_s19, %s1234_s20  ;;  %p1240_p2 = scmp.lt.s32.totalorder %s1234_s20, %s1234_s20 }
   0x8   :  { %p1241_p3 = por %p1240_p2, %p1239_p1 }
   0xa   :  { %p1242_p4 = pnand %p1241_p3, %p1235_p0 }
   0xc   :  { %1245 = shalt.err (!%p1242_p4)
}
   0xd   :  { %s1335_s21 = smov 512   ;;  %s1336_s22 = smov 32  }
   0xe   :  { %55 = dma.hbm_to_vmem [thread:$0]  %s1576_s5, 8192, %s50_s19, [#allocation6], %s1335_s21, %s1335_s21, %s1336_s22  }
   0xf   :  { %s1337_s25 = smov [#allocation2]  }
  0x10   :  { %s31_s26 = sshll.u32 %s1337_s25, 4  ;;  %s32_s26 = int_to_ptr.vmem [resolvable:$true] %s31_s26 }
  0x11   :  { %s1254_s27 = scalar_lea.vmem %s32_s26, 2048  ;;  %p1259_p6 = scmp.lt.s32.totalorder %s32_s26, %s32_s26 }
  0x12   :  { %p1255_p5 = scmp.ne.s32.totalorder %s32_s26, %s1254_s27  ;;  %p1260_p7 = scmp.lt.s32.totalorder %s1254_s27, %s1254_s27 }
  0x14   :  { %p1261_p8 = por %p1260_p7, %p1259_p6 }
  0x16   :  { %p1262_p9 = pnand %p1261_p8, %p1255_p5 }
  0x18   :  { %1265 = shalt.err (!%p1262_p9)
}
  0x19   :  { %s1338_s28 = smov 128   ;;  %s1339_s29 = smov 8  }
  0x1a   :  { %37 = dma.hbm_to_vmem [thread:$0]  %s1572_s1, 2048, %s32_s26, [#allocation3], %s1338_s28, %s1338_s28, %s1339_s29  }
  0x1b   :  { %s1340_s17 = smov [#allocation7]   ;;  %s1341_s20 = smov [#allocation8]  }
  0x1c   :  { %s67_s18 = sshll.u32 %s1340_s17, 4  ;;  %s85_s5 = sshll.u32 %s1341_s20, 4  ;;  %s68_s18 = int_to_ptr.vmem [resolvable:$true] %s67_s18  ;;  %s86_s5 = int_to_ptr.vmem [resolvable:$true] %s85_s5 }
  0x1d   :  { %s1274_s19 = scalar_lea.vmem %s68_s18, 8192  ;;  %p1279_p11 = scmp.lt.s32.totalorder %s68_s18, %s68_s18 }
  0x1e   :  { %p1275_p10 = scmp.ne.s32.totalorder %s68_s18, %s1274_s19  ;;  %p1280_p12 = scmp.lt.s32.totalorder %s1274_s19, %s1274_s19 }
  0x20   :  { %p1281_p13 = por %p1280_p12, %p1279_p11 }
  0x22   :  { %p1282_p0 = pnand %p1281_p13, %p1275_p10 }
  0x24   :  { %1285 = shalt.err (!%p1282_p0)
}
  0x25   :  { %73 = dma.hbm_to_vmem [thread:$0]  %s1580_s9, 8192, %s68_s18, [#allocation6], %s1338_s28, %s1338_s28, %s1339_s29  }
  0x26   :  { %s1294_s23 = scalar_lea.vmem %s86_s5, 2048  ;;  %p1299_p2 = scmp.lt.s32.totalorder %s86_s5, %s86_s5 }
  0x27   :  { %p1295_p1 = scmp.ne.s32.totalorder %s86_s5, %s1294_s23  ;;  %p1300_p3 = scmp.lt.s32.totalorder %s1294_s23, %s1294_s23 }
  0x29   :  { %p1301_p4 = por %p1300_p3, %p1299_p2 }
  0x2b   :  { %p1302_p5 = pnand %p1301_p4, %p1295_p1 }
  0x2d   :  { %1305 = shalt.err (!%p1302_p5)
}
  0x2e   :  { %91 = dma.hbm_to_vmem [thread:$0]  %s1584_s13, 2048, %s86_s5, [#allocation9], %s1338_s28, %s1338_s28, %s1339_s29  }
  0x2f   :  { %1326 = dma.done.wait [#allocation3], 2048  }
  0x30   :  { %1327 = vsyncadd [#allocation3], 4294965248 }
  0x31   :  { %1328 = dma.done.wait [#allocation6], 16384  }
  0x32   :  { %1329 = vsyncadd [#allocation6], 4294950912 }
  0x33   :  { %1330 = dma.done.wait [#allocation9], 2048  }
  0x34   :  { %1331 = vsyncadd [#allocation9], 4294965248  ;;  %v1342_v0 = vmov 0.0   ;;  %vm1343_vm0 = vmmov 0   ;;  %v122_v1 = vld [vmem:[#allocation2 + $0x78] sm:$0xff]  ;;  %v121_v2 = vld [vmem:[#allocation2 + $0x70] sm:$0xff] }
  0x35   :  { %1132 = vmatprep.subr.mxu0 %v1342_v0  ;;  %1164 = vmatprep.mubr.msk.f32.mxu0 %vm1343_vm0, %v1342_v0  ;;  %v120_v3 = vld [vmem:[#allocation2 + $0x68] sm:$0xff]  ;;  %v119_v4 = vld [vmem:[#allocation2 + $0x60] sm:$0xff]  ;;  %v118_v5 = vld [vmem:[#allocation2 + $0x58] sm:$0xff] }
  0x36   :  { %390 = vmatprep.mubr.f32.mxu1 %v1342_v0  ;;  %1133 = vmatpush3.msra.mxu0 %v122_v1  ;;  %v117_v6 = vld [vmem:[#allocation2 + $0x50] sm:$0xff]  ;;  %v116_v7 = vld [vmem:[#allocation2 + $0x48] sm:$0xff]  ;;  %v115_v8 = vld [vmem:[#allocation2 + $0x40] sm:$0xff] }
  0x37   :  { %1134 = vmatprep.subr.mxu0 %v1342_v0  ;;  %v114_v9 = vld [vmem:[#allocation2 + $0x38] sm:$0xff]  ;;  %v113_v10 = vld [vmem:[#allocation2 + $0x30] sm:$0xff]  ;;  %v112_v11 = vld [vmem:[#allocation2 + $0x28] sm:$0xff] }
  0x38   :  { %1135 = vmatpush3.msra.mxu0 %v121_v2  ;;  %v111_v12 = vld [vmem:[#allocation2 + $0x20] sm:$0xff]  ;;  %v110_v13 = vld [vmem:[#allocation2 + $0x18] sm:$0xff]  ;;  %v109_v14 = vld [vmem:[#allocation2 + $0x10] sm:$0xff] }
  0x39   :  { %1136 = vmatprep.subr.mxu0 %v1342_v0  ;;  %v108_v15 = vld [vmem:[#allocation2 + $0x8] sm:$0xff]  ;;  %v107_v16 = vld [vmem:[#allocation2] sm:$0xff]  ;;  %v303_v19 = vld [vmem:[#allocation5 + $0x1f8] sm:$0xff] }
  0x3a   :  { %1137 = vmatpush3.msra.mxu0 %v120_v3  ;;  %v106_v17 = vld [vmem:[%s1571_s0] sm:$0xff]  ;;  %v301_v18 = vld [vmem:[#allocation5 + $0x1e8] sm:$0xff]  ;;  %v302_v21 = vld [vmem:[#allocation5 + $0x1f0] sm:$0xff] }
  0x3b   :  { %1138 = vmatprep.subr.mxu0 %v1342_v0  ;;  %326 = vmatprep.subr.mxu1 %v301_v18  ;;  %v300_v20 = vld [vmem:[#allocation5 + $0x1e0] sm:$0xff]  ;;  %v297_v22 = vld [vmem:[#allocation5 + $0x1c8] sm:$0xff]  ;;  %v299_v23 = vld [vmem:[#allocation5 + $0x1d8] sm:$0xff] }
  0x3c   :  { %1139 = vmatpush3.msra.mxu0 %v119_v4  ;;  %327 = vmatpush1.msra.mxu1 %v300_v20  ;;  %v296_v24 = vld [vmem:[#allocation5 + $0x1c0] sm:$0xff]  ;;  %v298_v25 = vld [vmem:[#allocation5 + $0x1d0] sm:$0xff]  ;;  %v293_v26 = vld [vmem:[#allocation5 + $0x1a8] sm:$0xff] }
  0x3d   :  { %1140 = vmatprep.subr.mxu0 %v1342_v0  ;;  %328 = vmatprep.subr.mxu1 %v297_v22  ;;  %v295_v27 = vld [vmem:[#allocation5 + $0x1b8] sm:$0xff]  ;;  %v292_v28 = vld [vmem:[#allocation5 + $0x1a0] sm:$0xff]  ;;  %v294_v29 = vld [vmem:[#allocation5 + $0x1b0] sm:$0xff] }
  0x3e   :  { %1141 = vmatpush3.msra.mxu0 %v118_v5  ;;  %329 = vmatpush1.msra.mxu1 %v296_v24  ;;  %v289_v30 = vld [vmem:[#allocation5 + $0x188] sm:$0xff]  ;;  %v291_v31 = vld [vmem:[#allocation5 + $0x198] sm:$0xff]  ;;  %v288_v32 = vld [vmem:[#allocation5 + $0x180] sm:$0xff] }
  0x3f   :  { %1142 = vmatprep.subr.mxu0 %v1342_v0  ;;  %330 = vmatprep.subr.mxu1 %v293_v26  ;;  %v290_v33 = vld [vmem:[#allocation5 + $0x190] sm:$0xff]  ;;  %v285_v34 = vld [vmem:[#allocation5 + $0x168] sm:$0xff]  ;;  %v287_v35 = vld [vmem:[#allocation5 + $0x178] sm:$0xff] }
  0x40   :  { %1143 = vmatpush3.msra.mxu0 %v117_v6  ;;  %331 = vmatpush1.msra.mxu1 %v292_v28  ;;  %v284_v36 = vld [vmem:[#allocation5 + $0x160] sm:$0xff]  ;;  %v286_v37 = vld [vmem:[#allocation5 + $0x170] sm:$0xff]  ;;  %v281_v38 = vld [vmem:[#allocation5 + $0x148] sm:$0xff] }
  0x41   :  { %1144 = vmatprep.subr.mxu0 %v1342_v0  ;;  %332 = vmatprep.subr.mxu1 %v289_v30  ;;  %v283_v39 = vld [vmem:[#allocation5 + $0x158] sm:$0xff]  ;;  %v280_v40 = vld [vmem:[#allocation5 + $0x140] sm:$0xff]  ;;  %v282_v41 = vld [vmem:[#allocation5 + $0x150] sm:$0xff] }
  0x42   :  { %1145 = vmatpush3.msra.mxu0 %v116_v7  ;;  %333 = vmatpush1.msra.mxu1 %v288_v32  ;;  %v277_v42 = vld [vmem:[#allocation5 + $0x128] sm:$0xff]  ;;  %v279_v43 = vld [vmem:[#allocation5 + $0x138] sm:$0xff]  ;;  %v276_v44 = vld [vmem:[#allocation5 + $0x120] sm:$0xff] }
  0x43   :  { %1146 = vmatprep.subr.mxu0 %v1342_v0  ;;  %334 = vmatprep.subr.mxu1 %v285_v34  ;;  %v278_v45 = vld [vmem:[#allocation5 + $0x130] sm:$0xff]  ;;  %v273_v46 = vld [vmem:[#allocation5 + $0x108] sm:$0xff]  ;;  %v275_v47 = vld [vmem:[#allocation5 + $0x118] sm:$0xff] }
  0x44   :  { %1147 = vmatpush3.msra.mxu0 %v115_v8  ;;  %335 = vmatpush1.msra.mxu1 %v284_v36  ;;  %v272_v48 = vld [vmem:[#allocation5 + $0x100] sm:$0xff]  ;;  %v274_v49 = vld [vmem:[#allocation5 + $0x110] sm:$0xff]  ;;  %v269_v50 = vld [vmem:[#allocation5 + $0xe8] sm:$0xff] }
  0x45   :  { %1148 = vmatprep.subr.mxu0 %v1342_v0  ;;  %336 = vmatprep.subr.mxu1 %v281_v38  ;;  %v271_v51 = vld [vmem:[#allocation5 + $0xf8] sm:$0xff]  ;;  %v268_v52 = vld [vmem:[#allocation5 + $0xe0] sm:$0xff]  ;;  %v270_v53 = vld [vmem:[#allocation5 + $0xf0] sm:$0xff] }
  0x46   :  { %1149 = vmatpush3.msra.mxu0 %v114_v9  ;;  %337 = vmatpush1.msra.mxu1 %v280_v40  ;;  %v265_v54 = vld [vmem:[#allocation5 + $0xc8] sm:$0xff]  ;;  %v267_v55 = vld [vmem:[#allocation5 + $0xd8] sm:$0xff]  ;;  %v264_v56 = vld [vmem:[#allocation5 + $0xc0] sm:$0xff] }
  0x47   :  { %1150 = vmatprep.subr.mxu0 %v1342_v0  ;;  %338 = vmatprep.subr.mxu1 %v277_v42  ;;  %v266_v57 = vld [vmem:[#allocation5 + $0xd0] sm:$0xff]  ;;  %v261_v58 = vld [vmem:[#allocation5 + $0xa8] sm:$0xff]  ;;  %v263_v59 = vld [vmem:[#allocation5 + $0xb8] sm:$0xff]  ;;  %v227_v42 = vlaneseq }
  0x48   :  { %1151 = vmatpush3.msra.mxu0 %v113_v10  ;;  %339 = vmatpush1.msra.mxu1 %v276_v44  ;;  %v260_v60 = vld [vmem:[#allocation5 + $0xa0] sm:$0xff]  ;;  %v262_v61 = vld [vmem:[#allocation5 + $0xb0] sm:$0xff]  ;;  %v257_v62 = vld [vmem:[#allocation5 + $0x88] sm:$0xff] }
  0x49   :  { %1152 = vmatprep.subr.mxu0 %v1342_v0  ;;  %340 = vmatprep.subr.mxu1 %v273_v46  ;;  %v259_v63 = vld [vmem:[#allocation5 + $0x98] sm:$0xff]  ;;  %v256_v1 = vld [vmem:[#allocation5 + $0x80] sm:$0xff]  ;;  %v258_v2 = vld [vmem:[#allocation5 + $0x90] sm:$0xff] }
  0x4a   :  { %1153 = vmatpush3.msra.mxu0 %v112_v11  ;;  %341 = vmatpush1.msra.mxu1 %v272_v48  ;;  %v253_v3 = vld [vmem:[#allocation5 + $0x68] sm:$0xff]  ;;  %v255_v4 = vld [vmem:[#allocation5 + $0x78] sm:$0xff]  ;;  %v252_v5 = vld [vmem:[#allocation5 + $0x60] sm:$0xff] }
  0x4b   :  { %1154 = vmatprep.subr.mxu0 %v1342_v0  ;;  %342 = vmatprep.subr.mxu1 %v269_v50  ;;  %v254_v6 = vld [vmem:[#allocation5 + $0x70] sm:$0xff]  ;;  %v249_v7 = vld [vmem:[#allocation5 + $0x48] sm:$0xff]  ;;  %v251_v8 = vld [vmem:[#allocation5 + $0x58] sm:$0xff] }
  0x4c   :  { %1155 = vmatpush3.msra.mxu0 %v111_v12  ;;  %343 = vmatpush1.msra.mxu1 %v268_v52  ;;  %v248_v9 = vld [vmem:[#allocation5 + $0x40] sm:$0xff]  ;;  %v250_v10 = vld [vmem:[#allocation5 + $0x50] sm:$0xff]  ;;  %v245_v11 = vld [vmem:[#allocation5 + $0x28] sm:$0xff] }
  0x4d   :  { %1156 = vmatprep.subr.mxu0 %v1342_v0  ;;  %344 = vmatprep.subr.mxu1 %v265_v54  ;;  %v247_v12 = vld [vmem:[#allocation5 + $0x38] sm:$0xff]  ;;  %v242_v18 = vld [vmem:[#allocation5 + $0x10] sm:$0xff]  ;;  %v219_v44 = vld [vmem:[%s1574_s3] sm:$0x1] }
  0x4e   :  { %1157 = vmatpush3.msra.mxu0 %v110_v13  ;;  %345 = vmatpush1.msra.mxu1 %v264_v56  ;;  %v244_v13 = vld [vmem:[#allocation5 + $0x20] sm:$0xff]  ;;  %v727_v56 = vld [vmem:[#allocation7 + $0x1f8] sm:$0xff] }
  0x4f   :  { %1158 = vmatprep.subr.mxu0 %v1342_v0  ;;  %346 = vmatprep.subr.mxu1 %v261_v58  ;;  %v223_v48 = vld [vmem:[%s1575_s4] sm:$0x1]  ;;  %v711_v58 = vld [vmem:[#allocation7 + $0x178] sm:$0xff] }
  0x50   :  { %1159 = vmatpush3.msra.mxu0 %v109_v14  ;;  %347 = vmatpush1.msra.mxu1 %v260_v60  ;;  %v246_v14 = vld [vmem:[#allocation5 + $0x30] sm:$0xff] }
  0x51   :  { %1160 = vmatprep.subr.mxu0 %v1342_v0  ;;  %348 = vmatprep.subr.mxu1 %v257_v62  ;;  %v726_v60 = vld [vmem:[#allocation7 + $0x1f0] sm:$0xff] }
  0x52   :  { %1161 = vmatpush3.msra.mxu0 %v108_v15  ;;  %349 = vmatpush1.msra.mxu1 %v256_v1  ;;  %v241_v15 = vld [vmem:[#allocation5 + $0x8] sm:$0xff]  ;;  %v710_v62 = vld [vmem:[#allocation7 + $0x170] sm:$0xff] }
  0x53   :  { %1162 = vmatprep.subr.mxu0 %v1342_v0  ;;  %350 = vmatprep.subr.mxu1 %v253_v3  ;;  %v725_v1 = vld [vmem:[#allocation7 + $0x1e8] sm:$0xff] }
  0x54   :  { %1163 = vmatpush3.msra.mxu0 %v107_v16  ;;  %351 = vmatpush1.msra.mxu1 %v252_v5  ;;  %v243_v16 = vld [vmem:[#allocation5 + $0x18] sm:$0xff]  ;;  %v709_v3 = vld [vmem:[#allocation7 + $0x168] sm:$0xff]  ;;  %v724_v5 = vld [vmem:[#allocation7 + $0x1e0] sm:$0xff] }
  0x55   :  { %1165 = vmatmul.mubr.f32.vlgmr.msra.gmra.mxu0 %v106_v17  ;;  %397 = vmatprep.subr.mxu0 %v303_v19  ;;  %v240_v17 = vld [vmem:[#allocation5] sm:$0xff] }
  0x56   :  { %461 = vmatprep.mubr.f32.mxu0 %v1342_v0  ;;  %398 = vmatpush1.msra.mxu0 %v302_v21  ;;  %v1025_v19 = vld [vmem:[%s1573_s2] ss:$0 sm:$0xff] }
  0x57   :  { %399 = vmatprep.subr.mxu0 %v299_v23  ;;  %352 = vmatprep.subr.mxu1 %v249_v7  ;;  %v708_v7 = vld [vmem:[#allocation7 + $0x160] sm:$0xff] }
  0x58   :  { %400 = vmatpush1.msra.mxu0 %v298_v25  ;;  %353 = vmatpush1.msra.mxu1 %v248_v9  ;;  %v723_v9 = vld [vmem:[#allocation7 + $0x1d8] sm:$0xff] }
  0x59   :  { %401 = vmatprep.subr.mxu0 %v295_v27  ;;  %354 = vmatprep.subr.mxu1 %v245_v11  ;;  %v707_v11 = vld [vmem:[#allocation7 + $0x158] sm:$0xff] }
  0x5a   :  { %402 = vmatpush1.msra.mxu0 %v294_v29  ;;  %355 = vmatpush1.msra.mxu1 %v244_v13  ;;  %v722_v13 = vld [vmem:[#allocation7 + $0x1d0] sm:$0xff] }
  0x5b   :  { %403 = vmatprep.subr.mxu0 %v291_v31  ;;  %356 = vmatprep.subr.mxu1 %v241_v15  ;;  %v706_v15 = vld [vmem:[#allocation7 + $0x150] sm:$0xff] }
  0x5c   :  { %404 = vmatpush1.msra.mxu0 %v290_v33  ;;  %357 = vmatpush1.msra.mxu1 %v240_v17  ;;  %v721_v17 = vld [vmem:[#allocation7 + $0x1c8] sm:$0xff] }
  0x5d   :  { %405 = vmatprep.subr.mxu0 %v287_v35 }
  0x5e   :  { %406 = vmatpush1.msra.mxu0 %v286_v37 }
  0x5f   :  { %407 = vmatprep.subr.mxu0 %v283_v39 }
  0x60   :  { %408 = vmatpush1.msra.mxu0 %v282_v41 }
  0x61   :  { %409 = vmatprep.subr.mxu0 %v279_v43  ;;  %v1464_v43 = vshrl.u32 %v227_v42, 7  ;;  %v667_v42 = vld [vmem:[#allocation7 + $0x18] sm:$0xff] }
  0x62   :  { %410 = vmatpush1.msra.mxu0 %v278_v45 }
  0x63   :  { %411 = vmatprep.subr.mxu0 %v275_v47  ;;  %v1470_v45 = vsub.s32 0, %v1464_v43 }
  0x64   :  { %412 = vmatpush1.msra.mxu0 %v274_v49 }
  0x65   :  { %413 = vmatprep.subr.mxu0 %v271_v51 }
  0x66   :  { %414 = vmatpush1.msra.mxu0 %v270_v53 }
  0x67   :  { %415 = vmatprep.subr.mxu0 %v267_v55  ;;  %v695_v55 = vld [vmem:[#allocation7 + $0xf8] sm:$0xff] }
  0x68   :  { %416 = vmatpush1.msra.mxu0 %v266_v57  ;;  %1045 = vmatprep.subr.mxu1 %v695_v55  ;;  %v679_v57 = vld [vmem:[#allocation7 + $0x78] sm:$0xff]  ;;  %v712_v55 = vld [vmem:[#allocation7 + $0x180] sm:$0xff] }
  0x69   :  { %417 = vmatprep.subr.mxu0 %v263_v59  ;;  %v694_v59 = vld [vmem:[#allocation7 + $0xf0] sm:$0xff] }
  0x6a   :  { %418 = vmatpush1.msra.mxu0 %v262_v61  ;;  %v678_v61 = vld [vmem:[#allocation7 + $0x70] sm:$0xff] }
  0x6b   :  { %419 = vmatprep.subr.mxu0 %v259_v63  ;;  %v693_v63 = vld [vmem:[#allocation7 + $0xe8] sm:$0xff] }
  0x6c   :  { %420 = vmatpush1.msra.mxu0 %v258_v2  ;;  %v677_v2 = vld [vmem:[#allocation7 + $0x68] sm:$0xff] }
  0x6d   :  { %421 = vmatprep.subr.mxu0 %v255_v4  ;;  %v692_v4 = vld [vmem:[#allocation7 + $0xe0] sm:$0xff] }
  0x6e   :  { %422 = vmatpush1.msra.mxu0 %v254_v6  ;;  %v676_v6 = vld [vmem:[#allocation7 + $0x60] sm:$0xff] }
  0x6f   :  { %423 = vmatprep.subr.mxu0 %v251_v8  ;;  %v691_v8 = vld [vmem:[#allocation7 + $0xd8] sm:$0xff] }
  0x70   :  { %424 = vmatpush1.msra.mxu0 %v250_v10  ;;  %v675_v10 = vld [vmem:[#allocation7 + $0x58] sm:$0xff] }
  0x71   :  { %425 = vmatprep.subr.mxu0 %v247_v12  ;;  %v690_v12 = vld [vmem:[#allocation7 + $0xd0] sm:$0xff] }
  0x72   :  { %426 = vmatpush1.msra.mxu0 %v246_v14  ;;  %v674_v14 = vld [vmem:[#allocation7 + $0x50] sm:$0xff] }
  0x73   :  { %427 = vmatprep.subr.mxu0 %v243_v16  ;;  %v689_v16 = vld [vmem:[#allocation7 + $0xc8] sm:$0xff] }
  0x74   :  { %428 = vmatpush1.msra.mxu0 %v242_v18  ;;  %v673_v18 = vld [vmem:[#allocation7 + $0x48] sm:$0xff] }
  0x75   :  { %1080 = vmatprep.subr.mxu0 %v727_v56  ;;  %v664_v56 = vld [vmem:[#allocation7] sm:$0xff] }
 0x115   :  { %v196_v20 = vpop.f32.mrf.mxu0 }
 0x116   :  { %v197_v21 = vadd.f32 %v1025_v19, %v196_v20  ;;  %v705_v19 = vld [vmem:[#allocation7 + $0x148] sm:$0xff]  ;;  %v688_v20 = vld [vmem:[#allocation7 + $0xc0] sm:$0xff] }
 0x117   :  { %v1166_v22 = vpop.f32.mrf.mxu0 }
 0x118   :  { %v200_v23 = vrot.slane %v197_v21, 4  ;;  %v208_v24 = vmul.f32 %v197_v21, %v197_v21  ;;  %v672_v22 = vld [vmem:[#allocation7 + $0x40] sm:$0xff] }
 0x11a   :  { %v201_v25 = vadd.f32 %v200_v23, %v197_v21  ;;  %v209_v26 = vrot.slane %v208_v24, 4  ;;  %v704_v23 = vld [vmem:[#allocation7 + $0x140] sm:$0xff] }
 0x11c   :  { %v202_v27 = vrot.slane %v201_v25, 2  ;;  %v210_v28 = vadd.f32 %v209_v26, %v208_v24  ;;  %v687_v24 = vld [vmem:[#allocation7 + $0xb8] sm:$0xff] }
 0x11d   :  { %v671_v26 = vld [vmem:[#allocation7 + $0x38] sm:$0xff] }
 0x11e   :  { %v203_v29 = vadd.f32 %v202_v27, %v201_v25  ;;  %v211_v30 = vrot.slane %v210_v28, 2  ;;  %v719_v25 = vld [vmem:[#allocation7 + $0x1b8] sm:$0xff] }
 0x11f   :  { %v703_v27 = vld [vmem:[#allocation7 + $0x138] sm:$0xff] }
 0x120   :  { %v204_v31 = vrot.slane %v203_v29, 1  ;;  %v212_v32 = vadd.f32 %v211_v30, %v210_v28  ;;  %v686_v28 = vld [vmem:[#allocation7 + $0xb0] sm:$0xff] }
 0x121   :  { %v670_v30 = vld [vmem:[#allocation7 + $0x30] sm:$0xff] }
 0x122   :  { %v213_v33 = vrot.slane %v212_v32, 1  ;;  %v205_v34 = vadd.f32 %v204_v31, %v203_v29  ;;  %v718_v29 = vld [vmem:[#allocation7 + $0x1b0] sm:$0xff] }
 0x123   :  { %v702_v31 = vld [vmem:[#allocation7 + $0x130] sm:$0xff] }
 0x124   :  { %v214_v35 = vadd.f32 %v213_v33, %v212_v32  ;;  %v207_v36 = vmul.f32 0.125, %v205_v34  ;;  %v685_v32 = vld [vmem:[#allocation7 + $0xa8] sm:$0xff] }
 0x125   :  { %v717_v33 = vld [vmem:[#allocation7 + $0x1a8] sm:$0xff] }
 0x126   :  { %v215_v37 = vmul.f32 0.125, %v214_v35  ;;  %v216_v38 = vmul.f32 %v207_v36, %v207_v36  ;;  %v669_v34 = vld [vmem:[#allocation7 + $0x28] sm:$0xff] }
 0x127   :  { %v701_v35 = vld [vmem:[#allocation7 + $0x128] sm:$0xff] }
 0x128   :  { %v217_v39 = vsub.f32 %v215_v37, %v216_v38  ;;  %v716_v37 = vld [vmem:[#allocation7 + $0x1a0] sm:$0xff] }
 0x129   :  { %v668_v38 = vld [vmem:[#allocation7 + $0x20] sm:$0xff] }
 0x12a   :  { %v218_v40 = vmax.f32 %v217_v39, 0.0  ;;  %v700_v39 = vld [vmem:[#allocation7 + $0x120] sm:$0xff] }
 0x12c   :  { %v220_v41 = vadd.f32 1e-05, %v218_v40  ;;  %v683_v40 = vld [vmem:[#allocation7 + $0x98] sm:$0xff] }
 0x12e   :  { %1214 = vrsqrt.f32 %v220_v41  ;;  %v715_v41 = vld [vmem:[#allocation7 + $0x198] sm:$0xff] }
 0x13b   :  { %v1215_v46 = vpop.eup %1214 }
 0x13c   :  { %v222_v47 = vmul.f32 %v1215_v46, %v219_v44  ;;  %v699_v44 = vld [vmem:[#allocation7 + $0x118] sm:$0xff]  ;;  %v682_v46 = vld [vmem:[#allocation7 + $0x90] sm:$0xff] }
 0x13e   :  { %v224_v49 = vmul.f32 %v222_v47, %v207_v36  ;;  %v230_v50 = vrot.slane %v222_v47, %v1470_v45  ;;  %v684_v36 = vld [vmem:[#allocation7 + $0xa0] sm:$0xff]  ;;  %v714_v47 = vld [vmem:[#allocation7 + $0x190] sm:$0xff] }
 0x140   :  { %v225_v51 = vsub.f32 %v223_v48, %v224_v49  ;;  %v232_v52 = vmul.f32 %v230_v50, %v197_v21  ;;  %v720_v21 = vld [vmem:[#allocation7 + $0x1c0] sm:$0xff]  ;;  %v666_v48 = vld [vmem:[#allocation7 + $0x10] sm:$0xff]  ;;  %v681_v50 = vld [vmem:[#allocation7 + $0x88] sm:$0xff] }
 0x141   :  { %v698_v49 = vld [vmem:[#allocation7 + $0x110] sm:$0xff] }
 0x142   :  { %v237_v53 = vrot.slane %v225_v51, %v1470_v45  ;;  %v713_v51 = vld [vmem:[#allocation7 + $0x188] sm:$0xff] }
 0x144   :  { %v239_v54 = vadd.f32 %v237_v53, %v232_v52  ;;  %v665_v52 = vld [vmem:[#allocation7 + $0x8] sm:$0xff] }
 0x145   :  { %v697_v53 = vld [vmem:[#allocation7 + $0x108] sm:$0xff] }
 0x146   :  { %391 = vmatmul.mubr.f32.vlgmr.msra.gmra.mxu1 %v239_v54  ;;  %462 = vmatmul.mubr.f32.vlgmr.msra.gmra.mxu0 %v239_v54  ;;  %v680_v54 = vld [vmem:[#allocation7 + $0x80] sm:$0xff] }
 0x147   :  { %1046 = vmatpush3.msra.mxu1 %v679_v57  ;;  %1081 = vmatpush3.msra.mxu0 %v711_v58  ;;  %v696_v57 = vld [vmem:[#allocation7 + $0x100] sm:$0xff]  ;;  %v1479_v58 = vsub.s32 2, %v1464_v43 }
 0x148   :  { %1047 = vmatprep.subr.mxu1 %v694_v59  ;;  %1082 = vmatprep.subr.mxu0 %v726_v60  ;;  %v304_v59 = vld [vmem:[%s1577_s6] sm:$0xf]  ;;  %v1485_v60 = vsub.s32 1, %v1464_v43 }
 0x149   :  { %1048 = vmatpush3.msra.mxu1 %v678_v61  ;;  %1083 = vmatpush3.msra.mxu0 %v710_v62  ;;  %v1488_v61 = vsub.s32 3, %v1464_v43  ;;  %v309_v62 = vrot.slane %v304_v59, %v1470_v45 }
 0x14a   :  { %1049 = vmatprep.subr.mxu1 %v693_v63  ;;  %1084 = vmatprep.subr.mxu0 %v725_v1  ;;  %v317_v63 = vrot.slane %v304_v59, %v1479_v58 }
 0x14b   :  { %1050 = vmatpush3.msra.mxu1 %v677_v2  ;;  %1085 = vmatpush3.msra.mxu0 %v709_v3  ;;  %v313_v3 = vrot.slane %v304_v59, %v1485_v60 }
 0x14c   :  { %1051 = vmatprep.subr.mxu1 %v692_v4  ;;  %1086 = vmatprep.subr.mxu0 %v724_v5  ;;  %v321_v4 = vrot.slane %v304_v59, %v1488_v61 }
 0x14d   :  { %1052 = vmatpush3.msra.mxu1 %v676_v6  ;;  %1087 = vmatpush3.msra.mxu0 %v708_v7 }
 0x14e   :  { %1053 = vmatprep.subr.mxu1 %v691_v8  ;;  %1088 = vmatprep.subr.mxu0 %v723_v9 }
 0x14f   :  { %1054 = vmatpush3.msra.mxu1 %v675_v10  ;;  %1089 = vmatpush3.msra.mxu0 %v707_v11 }
 0x150   :  { %1055 = vmatprep.subr.mxu1 %v690_v12  ;;  %1090 = vmatprep.subr.mxu0 %v722_v13 }
 0x151   :  { %1056 = vmatpush3.msra.mxu1 %v674_v14  ;;  %1091 = vmatpush3.msra.mxu0 %v706_v15 }
 0x152   :  { %1057 = vmatprep.subr.mxu1 %v689_v16  ;;  %1092 = vmatprep.subr.mxu0 %v721_v17 }
 0x153   :  { %1058 = vmatpush3.msra.mxu1 %v673_v18  ;;  %1093 = vmatpush3.msra.mxu0 %v705_v19 }
 0x154   :  { %1059 = vmatprep.subr.mxu1 %v688_v20  ;;  %1094 = vmatprep.subr.mxu0 %v720_v21 }
 0x155   :  { %1060 = vmatpush3.msra.mxu1 %v672_v22  ;;  %1095 = vmatpush3.msra.mxu0 %v704_v23 }
 0x156   :  { %1061 = vmatprep.subr.mxu1 %v687_v24  ;;  %1096 = vmatprep.subr.mxu0 %v719_v25 }
 0x157   :  { %1062 = vmatpush3.msra.mxu1 %v671_v26  ;;  %1097 = vmatpush3.msra.mxu0 %v703_v27 }
 0x158   :  { %1063 = vmatprep.subr.mxu1 %v686_v28  ;;  %1098 = vmatprep.subr.mxu0 %v718_v29 }
 0x159   :  { %1064 = vmatpush3.msra.mxu1 %v670_v30  ;;  %1099 = vmatpush3.msra.mxu0 %v702_v31 }
 0x15a   :  { %1065 = vmatprep.subr.mxu1 %v685_v32  ;;  %1100 = vmatprep.subr.mxu0 %v717_v33 }
 0x15b   :  { %1066 = vmatpush3.msra.mxu1 %v669_v34  ;;  %1101 = vmatpush3.msra.mxu0 %v701_v35 }
 0x15c   :  { %1067 = vmatprep.subr.mxu1 %v684_v36  ;;  %1102 = vmatprep.subr.mxu0 %v716_v37 }
 0x15d   :  { %1068 = vmatpush3.msra.mxu1 %v668_v38  ;;  %1103 = vmatpush3.msra.mxu0 %v700_v39 }
 0x15e   :  { %1069 = vmatprep.subr.mxu1 %v683_v40  ;;  %1104 = vmatprep.subr.mxu0 %v715_v41 }
 0x15f   :  { %1070 = vmatpush3.msra.mxu1 %v667_v42  ;;  %1105 = vmatpush3.msra.mxu0 %v699_v44 }
 0x160   :  { %1071 = vmatprep.subr.mxu1 %v682_v46  ;;  %1106 = vmatprep.subr.mxu0 %v714_v47 }
 0x161   :  { %1072 = vmatpush3.msra.mxu1 %v666_v48  ;;  %1107 = vmatpush3.msra.mxu0 %v698_v49 }
 0x162   :  { %1073 = vmatprep.subr.mxu1 %v681_v50  ;;  %1108 = vmatprep.subr.mxu0 %v713_v51 }
 0x163   :  { %1074 = vmatpush3.msra.mxu1 %v665_v52  ;;  %1109 = vmatpush3.msra.mxu0 %v697_v53 }
 0x164   :  { %1075 = vmatprep.subr.mxu1 %v680_v54  ;;  %1110 = vmatprep.subr.mxu0 %v712_v55 }
 0x165   :  { %1076 = vmatpush3.msra.mxu1 %v664_v56  ;;  %1111 = vmatpush3.msra.mxu0 %v696_v57 }
 0x166   :  { %1167 = vmatprep.subr.mxu1 %v1342_v0 }
 0x206   :  { %v392_v1 = vpop.f32.mrf.mxu1  ;;  %v463_v2 = vpop.f32.mrf.mxu0 }
 0x207   :  { %v1494_v5 = vadd.f32 %v392_v1, %v309_v62  ;;  %v1496_v6 = vadd.f32 %v463_v2, %v317_v63 }
 0x208   :  { %v394_v7 = vpop.f32.mrf.mxu1  ;;  %v465_v8 = vpop.f32.mrf.mxu0 }
 0x209   :  { %v468_v9 = vrot.slane %v1494_v5, 4  ;;  %v496_v10 = vmul.f32 %v1494_v5, %v1494_v5  ;;  %v480_v11 = vrot.slane %v1496_v6, 4  ;;  %v498_v12 = vmul.f32 %v1496_v6, %v1496_v6 }
 0x20a   :  { %v1504_v13 = vadd.f32 %v394_v7, %v313_v3  ;;  %v1506_v14 = vadd.f32 %v465_v8, %v321_v4 }
 0x20b   :  { %v469_v15 = vadd.f32 %v468_v9, %v1494_v5  ;;  %v500_v16 = vrot.slane %v496_v10, 4  ;;  %v481_v17 = vadd.f32 %v480_v11, %v1496_v6  ;;  %v512_v18 = vrot.slane %v498_v12, 4 }
 0x20c   :  { %v474_v19 = vrot.slane %v1504_v13, 4  ;;  %v497_v20 = vmul.f32 %v1504_v13, %v1504_v13  ;;  %v486_v21 = vrot.slane %v1506_v14, 4  ;;  %v499_v22 = vmul.f32 %v1506_v14, %v1506_v14 }
 0x20d   :  { %v470_v23 = vrot.slane %v469_v15, 2  ;;  %v501_v24 = vadd.f32 %v500_v16, %v496_v10  ;;  %v482_v25 = vrot.slane %v481_v17, 2  ;;  %v513_v26 = vadd.f32 %v512_v18, %v498_v12 }
 0x20e   :  { %v475_v27 = vadd.f32 %v474_v19, %v1504_v13  ;;  %v506_v28 = vrot.slane %v497_v20, 4  ;;  %v487_v29 = vadd.f32 %v486_v21, %v1506_v14  ;;  %v518_v30 = vrot.slane %v499_v22, 4 }
 0x20f   :  { %v471_v31 = vadd.f32 %v470_v23, %v469_v15  ;;  %v502_v32 = vrot.slane %v501_v24, 2  ;;  %v483_v33 = vadd.f32 %v482_v25, %v481_v17  ;;  %v514_v34 = vrot.slane %v513_v26, 2 }
 0x210   :  { %v476_v35 = vrot.slane %v475_v27, 2  ;;  %v507_v36 = vadd.f32 %v506_v28, %v497_v20  ;;  %v488_v37 = vrot.slane %v487_v29, 2  ;;  %v519_v38 = vadd.f32 %v518_v30, %v499_v22 }
 0x211   :  { %v472_v39 = vrot.slane %v471_v31, 1  ;;  %v503_v40 = vadd.f32 %v502_v32, %v501_v24  ;;  %v484_v41 = vrot.slane %v483_v33, 1  ;;  %v515_v42 = vadd.f32 %v514_v34, %v513_v26 }
 0x212   :  { %v477_v44 = vadd.f32 %v476_v35, %v475_v27  ;;  %v508_v46 = vrot.slane %v507_v36, 2  ;;  %v489_v47 = vadd.f32 %v488_v37, %v487_v29  ;;  %v520_v48 = vrot.slane %v519_v38, 2 }
 0x213   :  { %v473_v49 = vadd.f32 %v472_v39, %v471_v31  ;;  %v504_v50 = vrot.slane %v503_v40, 1  ;;  %v485_v51 = vadd.f32 %v484_v41, %v483_v33  ;;  %v516_v52 = vrot.slane %v515_v42, 1 }
 0x214   :  { %v478_v53 = vrot.slane %v477_v44, 1  ;;  %v509_v54 = vadd.f32 %v508_v46, %v507_v36  ;;  %v490_v55 = vrot.slane %v489_v47, 1  ;;  %v521_v56 = vadd.f32 %v520_v48, %v519_v38  ;;  %v540_v48 = vld [vmem:[%s1578_s7] sm:$0xf] }
 0x215   :  { %v492_v57 = vmul.f32 0.125, %v473_v49  ;;  %v505_v59 = vadd.f32 %v504_v50, %v503_v40  ;;  %v494_v62 = vmul.f32 0.125, %v485_v51  ;;  %v517_v63 = vadd.f32 %v516_v52, %v515_v42 }
 0x216   :  { %v479_v1 = vadd.f32 %v478_v53, %v477_v44  ;;  %v510_v2 = vrot.slane %v509_v54, 1  ;;  %v491_v3 = vadd.f32 %v490_v55, %v489_v47  ;;  %v522_v4 = vrot.slane %v521_v56, 1 }
 0x217   :  { %v524_v7 = vmul.f32 0.125, %v505_v59  ;;  %v528_v8 = vmul.f32 %v492_v57, %v492_v57  ;;  %v526_v9 = vmul.f32 0.125, %v517_v63  ;;  %v530_v10 = vmul.f32 %v494_v62, %v494_v62 }
 0x218   :  { %v493_v11 = vmul.f32 0.125, %v479_v1  ;;  %v511_v12 = vadd.f32 %v510_v2, %v509_v54  ;;  %v495_v15 = vmul.f32 0.125, %v491_v3  ;;  %v523_v16 = vadd.f32 %v522_v4, %v521_v56 }
 0x219   :  { %v532_v17 = vsub.f32 %v524_v7, %v528_v8  ;;  %v534_v18 = vsub.f32 %v526_v9, %v530_v10  ;;  %v1344_v33 = vmov 1966171168   ;;  %v579_v7 = vld [vmem:[%s1579_s8] sm:$0xf] }
 0x21a   :  { %v525_v19 = vmul.f32 0.125, %v511_v12  ;;  %v529_v20 = vmul.f32 %v493_v11, %v493_v11  ;;  %v527_v21 = vmul.f32 0.125, %v523_v16  ;;  %v531_v22 = vmul.f32 %v495_v15, %v495_v15 }
 0x21b   :  { %v536_v23 = vmax.f32 %v532_v17, 0.0  ;;  %v538_v24 = vmax.f32 %v534_v18, 0.0  ;;  %v556_v34 = vunpack.c.l.s4 %v1344_v33  ;;  %v1026_v33 = vld [vmem:[%s1581_s10] ss:$0 sm:$0xff] }
 0x21c   :  { %v533_v25 = vsub.f32 %v525_v19, %v529_v20  ;;  %v535_v26 = vsub.f32 %v527_v21, %v531_v22  ;;  %v922_v22 = vld [vmem:[#allocation8 + $0x40] sm:$0xff] }
 0x21d   :  { %v541_v27 = vadd.f32 1e-05, %v536_v23  ;;  %v543_v28 = vadd.f32 1e-05, %v538_v24  ;;  %v557_v35 = vunpack.c.0.s8 %v556_v34  ;;  %v921_v23 = vld [vmem:[#allocation8 + $0x38] sm:$0xff]  ;;  %v920_v24 = vld [vmem:[#allocation8 + $0x30] sm:$0xff] }
 0x21e   :  { %v537_v29 = vmax.f32 %v533_v25, 0.0  ;;  %v539_v30 = vmax.f32 %v535_v26, 0.0  ;;  %v919_v25 = vld [vmem:[#allocation8 + $0x28] sm:$0xff]  ;;  %v918_v26 = vld [vmem:[#allocation8 + $0x20] sm:$0xff] }
 0x21f   :  { %1216 = vrsqrt.f32 %v541_v27  ;;  %v560_v38 = vsub.s32 %v557_v35, %v1464_v43  ;;  %v917_v27 = vld [vmem:[#allocation8 + $0x18] sm:$0xff] }
 0x220   :  { %v542_v31 = vadd.f32 1e-05, %v537_v29  ;;  %v544_v32 = vadd.f32 1e-05, %v539_v30  ;;  %1218 = vrsqrt.f32 %v543_v28  ;;  %v916_v28 = vld [vmem:[#allocation8 + $0x10] sm:$0xff]  ;;  %v915_v29 = vld [vmem:[#allocation8 + $0x8] sm:$0xff] }
 0x221   :  { %v914_v30 = vld [vmem:[#allocation8] sm:$0xff] }
 0x222   :  { %1220 = vrsqrt.f32 %v542_v31 }
 0x223   :  { %1222 = vrsqrt.f32 %v544_v32 }
 0x22c   :  { %v1217_v36 = vpop.eup %1216 }
 0x22d   :  { %v1219_v37 = vpop.eup %1218 }
 0x22f   :  { %v1221_v39 = vpop.eup %1220 }
 0x230   :  { %v1223_v40 = vpop.eup %1222  ;;  %v553_v41 = vcombine.low %v1217_v36, %v1221_v39 }
 0x231   :  { %v554_v42 = vcombine.low %v1219_v37, %v1223_v40 }
 0x232   :  { %v561_v44 = vrot.slane %v553_v41, %v560_v38 }
 0x233   :  { %v568_v46 = vrot.slane %v554_v42, %v560_v38 }
 0x235   :  { %v569_v47 = vcombine.low %v561_v44, %v568_v46 }
 0x237   :  { %v576_v49 = vrot.slane %v569_v47, %v560_v38 }
 0x239   :  { %v578_v50 = vmul.f32 %v576_v49, %v540_v48 }
 0x23b   :  { %v592_v51 = vrot.slane %v578_v50, %v1479_v58  ;;  %v596_v52 = vrot.slane %v578_v50, %v1488_v61  ;;  %v584_v53 = vrot.slane %v578_v50, %v1470_v45  ;;  %v588_v43 = vrot.slane %v578_v50, %v1485_v60 }
 0x23d   :  { %v603_v54 = vmul.f32 %v592_v51, %v494_v62  ;;  %v604_v55 = vmul.f32 %v596_v52, %v495_v15  ;;  %v601_v56 = vmul.f32 %v584_v53, %v492_v57  ;;  %v602_v59 = vmul.f32 %v588_v43, %v493_v11 }
 0x23e   :  { %v636_v10 = vmul.f32 %v588_v43, %v1504_v13  ;;  %v638_v12 = vmul.f32 %v596_v52, %v1506_v14  ;;  %v635_v62 = vmul.f32 %v584_v53, %v1494_v5  ;;  %v637_v57 = vmul.f32 %v592_v51, %v1496_v6  ;;  %v929_v5 = vld [vmem:[#allocation8 + $0x78] sm:$0xff]  ;;  %v924_v13 = vld [vmem:[#allocation8 + $0x50] sm:$0xff]  ;;  %v923_v14 = vld [vmem:[#allocation8 + $0x48] sm:$0xff] }
 0x23f   :  { %v610_v63 = vcombine.low %v603_v54, %v604_v55  ;;  %v609_v1 = vcombine.low %v601_v56, %v602_v59  ;;  %v925_v6 = vld [vmem:[#allocation8 + $0x58] sm:$0xff] }
 0x241   :  { %v624_v2 = vrot.slane %v610_v63, %v560_v38  ;;  %v617_v3 = vrot.slane %v609_v1, %v560_v38  ;;  %v893_v1 = vld [vmem:[%s1582_s11] sm:$0x1]  ;;  %s1345_s11 = smov [#allocation10]  }
 0x242   :  { %s1014_s21 = sshll.u32 %s1345_s11, 4  ;;  %s1015_s21 = int_to_ptr.vmem [resolvable:$true] %s1014_s21 }
 0x243   :  { %v625_v4 = vcombine.low %v617_v3, %v624_v2  ;;  %p1311_p7 = scmp.lt.s32.totalorder %s1015_s21, %s1015_s21 }
 0x245   :  { %v632_v8 = vrot.slane %v625_v4, %v560_v38  ;;  %v897_v4 = vld [vmem:[%s1583_s12] sm:$0x1]  ;;  %s1306_s12 = scalar_lea.vmem %s1015_s21, 128 }
 0x246   :  { %p1307_p6 = scmp.ne.s32.totalorder %s1015_s21, %s1306_s12  ;;  %p1312_p8 = scmp.lt.s32.totalorder %s1306_s12, %s1306_s12 }
 0x247   :  { %v634_v9 = vsub.f32 %v579_v7, %v632_v8 }
 0x248   :  { %p1313_p9 = por %p1312_p8, %p1311_p7 }
 0x249   :  { %v647_v11 = vrot.slane %v634_v9, %v1485_v60  ;;  %v655_v15 = vrot.slane %v634_v9, %v1488_v61  ;;  %v643_v16 = vrot.slane %v634_v9, %v1470_v45  ;;  %v651_v17 = vrot.slane %v634_v9, %v1479_v58  ;;  %v928_v60 = vld [vmem:[#allocation8 + $0x70] sm:$0xff]  ;;  %v927_v58 = vld [vmem:[#allocation8 + $0x68] sm:$0xff]  ;;  %v926_v61 = vld [vmem:[#allocation8 + $0x60] sm:$0xff] }
 0x24a   :  { %p1314_p10 = pnand %p1313_p9, %p1307_p6 }
 0x24b   :  { %v661_v18 = vadd.f32 %v647_v11, %v636_v10  ;;  %v663_v19 = vadd.f32 %v655_v15, %v638_v12  ;;  %v660_v20 = vadd.f32 %v643_v16, %v635_v62  ;;  %v662_v21 = vadd.f32 %v651_v17, %v637_v57  ;;  %v1027_v57 = vld [vmem:[%s1585_s14] ss:$0 sm:$0xff] }
 0x24d   :  { %799 = vmatprep.mubr.f32.mxu1 %v661_v18  ;;  %869 = vmatprep.mubr.f32.mxu0 %v663_v19 }
 0x24e   :  { %800 = vmatmul.mubr.f32.vlgmr.msra.gmra.mxu1 %v660_v20  ;;  %870 = vmatmul.mubr.f32.vlgmr.msra.gmra.mxu0 %v662_v21 }
 0x24f   :  { %1199 = vmatprep.mubr.msk.f32.mxu1 %vm1343_vm0, %v1342_v0  ;;  %1168 = vmatpush3.msra.mxu1 %v929_v5 }
 0x250   :  { %1169 = vmatprep.subr.mxu1 %v1342_v0 }
 0x251   :  { %1170 = vmatpush3.msra.mxu1 %v928_v60 }
 0x252   :  { %1171 = vmatprep.subr.mxu1 %v1342_v0 }
 0x253   :  { %1172 = vmatpush3.msra.mxu1 %v927_v58 }
 0x254   :  { %1173 = vmatprep.subr.mxu1 %v1342_v0 }
 0x255   :  { %1174 = vmatpush3.msra.mxu1 %v926_v61 }
 0x256   :  { %1175 = vmatprep.subr.mxu1 %v1342_v0 }
 0x257   :  { %1176 = vmatpush3.msra.mxu1 %v925_v6 }
 0x258   :  { %1177 = vmatprep.subr.mxu1 %v1342_v0 }
 0x259   :  { %1178 = vmatpush3.msra.mxu1 %v924_v13 }
 0x25a   :  { %1179 = vmatprep.subr.mxu1 %v1342_v0 }
 0x25b   :  { %1180 = vmatpush3.msra.mxu1 %v923_v14 }
 0x25c   :  { %1181 = vmatprep.subr.mxu1 %v1342_v0 }
 0x25d   :  { %1182 = vmatpush3.msra.mxu1 %v922_v22 }
 0x25e   :  { %1183 = vmatprep.subr.mxu1 %v1342_v0 }
 0x25f   :  { %1184 = vmatpush3.msra.mxu1 %v921_v23 }
 0x260   :  { %1185 = vmatprep.subr.mxu1 %v1342_v0 }
 0x261   :  { %1186 = vmatpush3.msra.mxu1 %v920_v24 }
 0x262   :  { %1187 = vmatprep.subr.mxu1 %v1342_v0 }
 0x263   :  { %1188 = vmatpush3.msra.mxu1 %v919_v25 }
 0x264   :  { %1189 = vmatprep.subr.mxu1 %v1342_v0 }
 0x265   :  { %1190 = vmatpush3.msra.mxu1 %v918_v26 }
 0x266   :  { %1191 = vmatprep.subr.mxu1 %v1342_v0 }
 0x267   :  { %1192 = vmatpush3.msra.mxu1 %v917_v27 }
 0x268   :  { %1193 = vmatprep.subr.mxu1 %v1342_v0 }
 0x269   :  { %1194 = vmatpush3.msra.mxu1 %v916_v28 }
 0x26a   :  { %1195 = vmatprep.subr.mxu1 %v1342_v0 }
 0x26b   :  { %1196 = vmatpush3.msra.mxu1 %v915_v29 }
 0x26c   :  { %1197 = vmatprep.subr.mxu1 %v1342_v0 }
 0x26d   :  { %1198 = vmatpush3.msra.mxu1 %v914_v30 }
 0x30e   :  { %v1077_v31 = vpop.f32.mrf.mxu1  ;;  %v1112_v32 = vpop.f32.mrf.mxu0 }
 0x310   :  { %v1078_v34 = vpop.f32.mrf.mxu1  ;;  %v1113_v35 = vpop.f32.mrf.mxu0 }
 0x311   :  { %v1079_v36 = vadd.f32 %v1078_v34, %v1077_v31  ;;  %v1114_v38 = vadd.f32 %v1113_v35, %v1112_v32 }
 0x313   :  { %v802_v37 = vadd.f32 %v1079_v36, %v1026_v33 }
 0x315   :  { %v872_v39 = vadd.f32 %v1114_v38, %v802_v37 }
 0x317   :  { %v875_v40 = vrot.slane %v872_v39, 4  ;;  %v882_v41 = vmul.f32 %v872_v39, %v872_v39 }
 0x319   :  { %v876_v42 = vadd.f32 %v875_v40, %v872_v39  ;;  %v883_v44 = vrot.slane %v882_v41, 4 }
 0x31b   :  { %v877_v46 = vrot.slane %v876_v42, 2  ;;  %v884_v47 = vadd.f32 %v883_v44, %v882_v41 }
 0x31d   :  { %v878_v0 = vadd.f32 %v877_v46, %v876_v42  ;;  %v885_v48 = vrot.slane %v884_v47, 2 }
 0x31f   :  { %v879_v49 = vrot.slane %v878_v0, 1  ;;  %v886_v50 = vadd.f32 %v885_v48, %v884_v47 }
 0x321   :  { %v880_v51 = vadd.f32 %v879_v49, %v878_v0  ;;  %v887_v52 = vrot.slane %v886_v50, 1 }
 0x323   :  { %v881_v53 = vmul.f32 0.125, %v880_v51  ;;  %v888_v43 = vadd.f32 %v887_v52, %v886_v50 }
 0x325   :  { %v889_v54 = vmul.f32 0.125, %v888_v43  ;;  %v890_v55 = vmul.f32 %v881_v53, %v881_v53 }
 0x327   :  { %v891_v56 = vsub.f32 %v889_v54, %v890_v55 }
 0x329   :  { %v892_v59 = vmax.f32 %v891_v56, 0.0 }
 0x32b   :  { %v894_v63 = vadd.f32 1e-05, %v892_v59 }
 0x32d   :  { %1224 = vrsqrt.f32 %v894_v63 }
 0x33a   :  { %v1225_v2 = vpop.eup %1224 }
 0x33b   :  { %v896_v3 = vmul.f32 %v1225_v2, %v893_v1 }
 0x33d   :  { %v898_v7 = vmul.f32 %v896_v3, %v881_v53  ;;  %v904_v8 = vrot.slane %v896_v3, %v1470_v45 }
 0x33f   :  { %v899_v9 = vsub.f32 %v897_v4, %v898_v7  ;;  %v906_v10 = vmul.f32 %v904_v8, %v872_v39 }
 0x341   :  { %v911_v12 = vrot.slane %v899_v9, %v1470_v45 }
 0x343   :  { %v913_v62 = vadd.f32 %v911_v12, %v906_v10 }
 0x345   :  { %1200 = vmatmul.mubr.f32.vlgmr.msra.gmra.mxu1 %v913_v62 }
 0x405   :  { %v1003_v11 = vpop.f32.mrf.mxu1 }
 0x406   :  { %v1004_v15 = vadd.f32 %v1027_v57, %v1003_v11 }
 0x407   :  { %v1201_v16 = vpop.f32.mrf.mxu1 }
 0x408   :  { %1007 = vst [vmem:[#allocation10] sm:$0xff] %v1004_v15 }
 0x409   :  { %1317 = shalt.err (!%p1314_p10)
}
 0x40a   :  { %1017 = dma.vmem_to_hbm [thread:$0]  %s1015_s21, 128, %s1586_s15, [#allocation4]  }
 0x40b   :  { %1332 = dma.done.wait [#allocation4], 128  }
 0x40c   :  { %1333 = vsyncadd [#allocation4], 4294967168 }
 0x40d   :  { %1021 = vsyncpa [#allocation3], 1 }
 0x40e   :  { %1022 = vsyncpa [#allocation6], 1 }
 0x40f   :  { %1023 = vsyncpa [#allocation9], 1 }
 0x410   :  { %1024 = vsyncpa [#allocation4], 1 }

</bundles_post_ra>
